<compile_context>
chip_gen: v7x
topology: tpu7x:2x2x1
jax: 0.10.0
libtpu: 0.0.40
codegen_flags: <defaults>
</compile_context>

<pallas_src>
import jax
import jax.numpy as jnp
from jax.experimental import pallas as pl
from jax.experimental.pallas import tpu as pltpu


# ----------------------------------------------------------------------------
# Pallas kernel: lane-dense elementwise multiply by the resident scaled mask.
# ----------------------------------------------------------------------------
def _apply_kernel(mask_ref, x_ref, o_ref):
    # mask stays f32 so the numel/sum normalization scale is not rounded to
    # bf16/fp16 when x is low precision; only the product is cast.
    o_ref[...] = (x_ref[...].astype(jnp.float32) * mask_ref[...]).astype(o_ref.dtype)


# ----------------------------------------------------------------------------
# Wrapper helpers.
# ----------------------------------------------------------------------------
def _compute_scaled_block_mask(mask, block_size):
    """Dilate the Bernoulli mask (separable max-filter), invert, fold in the
    numel/sum(block_mask) normalization scale.  Plain JAX: H*W elements only.

    Reproduces the PyTorch scatter of block_size x block_size squares anchored
    at every nonzero mask entry (padded bottom/right, cropped back to (H, W)):
        dilated[h, w] = max_{0<=di,dj<bs} mask[h-di, w-dj]   (0 out of bounds)
    """
    h, w = mask.shape
    m = mask.astype(jnp.float32)
    row = jnp.arange(h)[:, None]
    col = jnp.arange(w)[None, :]

    acc0 = m
    for di in range(1, block_size):
        shifted = jnp.roll(m, di, axis=0)
        acc0 = jnp.maximum(acc0, jnp.where(row >= di, shifted, 0.0))
    acc = acc0
    for dj in range(1, block_size):
        shifted = jnp.roll(acc0, dj, axis=1)
        acc = jnp.maximum(acc, jnp.where(col >= dj, shifted, 0.0))

    block_mask = 1.0 - acc                              # (H, W)
    denom = jnp.maximum(jnp.sum(block_mask), 1.0)       # guard all-dropped
    scale = jnp.float32(h * w) / denom                  # numel / sum
    return block_mask * scale                           # f32


def _choose_tile_nc(nc, hw_p, itemsize, target_bytes=4 << 20):
    """Fat tiles along the fused N*C axis (~4 MiB each).

    - Sublane alignment is dtype-aware (8 rows f32, 16 bf16, 32 int8) so
      packed-sublane dtypes don't hit masked edge loads/stores.
    - For problems larger than a few MiB, cap the tile so the grid has at
      least 2 steps, letting dimension_semantics=("parallel",) shard the work
      across v7x's two TensorCores.
    """
    sublane = max(8, 32 // max(1, itemsize))            # 8 / 16 / 32
    row_bytes = hw_p * itemsize
    total_bytes = nc * row_bytes

    rows = max(sublane, target_bytes // row_bytes)
    rows = max(sublane, (rows // sublane) * sublane)

    if total_bytes > (8 << 20):
        # Guarantee >= 2 grid steps: cap at round_up(cdiv(nc, 2), sublane).
        half = -(-nc // 2)
        half = -(-half // sublane) * sublane
        rows = max(sublane, min(rows, half))

    if rows >= nc:
        return nc                                       # single fat tile
    return rows


# ----------------------------------------------------------------------------
# DropBlock forward (training=True path).
# ----------------------------------------------------------------------------
def dropblock_forward(x, mask, block_size):
    """x: (N, C, H, W); mask: (H, W) Bernoulli(gamma) sample."""
    n, c, h, w = x.shape
    nc, hw = n * c, h * w

    # Tiny (H, W) mask math in plain JAX (no separate kernel launch).
    scaled_mask = _compute_scaled_block_mask(mask, block_size)   # (H, W) f32

    # Lane-dense layout: fuse N*C, put H*W on the lane axis, pad to 128 lanes.
    hw_p = ((hw + 127) // 128) * 128
    xf = x.reshape(nc, hw)
    mf = scaled_mask.reshape(1, hw)                              # stays f32
    if hw_p != hw:
        xf = jnp.pad(xf, ((0, 0), (0, hw_p - hw)))
        mf = jnp.pad(mf, ((0, 0), (0, hw_p - hw)))

    tile_nc = _choose_tile_nc(nc, hw_p, x.dtype.itemsize)
    grid = (pl.cdiv(nc, tile_nc),)

    out = pl.pallas_call(
        _apply_kernel,
        out_shape=jax.ShapeDtypeStruct((nc, hw_p), x.dtype),
        grid=grid,
        in_specs=[
            pl.BlockSpec((1, hw_p), lambda i: (0, 0)),           # shared f32 mask
            pl.BlockSpec((tile_nc, hw_p), lambda i: (i, 0)),     # fat lane-dense tile
        ],
        out_specs=pl.BlockSpec((tile_nc, hw_p), lambda i: (i, 0)),
        compiler_params=pltpu.CompilerParams(
            dimension_semantics=("parallel",),
            vmem_limit_bytes=32 << 20,                           # v5e headroom for 4 MiB tiles
        ),
    )(mf, xf)

    if hw_p != hw:
        out = out[:, :hw]
    return out.reshape(n, c, h, w)


# ----------------------------------------------------------------------------
# Pure-JAX reference (direct, non-separable dilation) for sanity checking.
# ----------------------------------------------------------------------------
def _reference(x, mask, block_size):
    h, w = mask.shape
    block_any = jnp.zeros((h, w), jnp.float32)
    row = jnp.arange(h)[:, None]
    col = jnp.arange(w)[None, :]
    for di in range(block_size):
        for dj in range(block_size):
            shifted = jnp.roll(jnp.roll(mask, di, axis=0), dj, axis=1)
            valid = (row >= di) & (col >= dj)
            block_any = jnp.maximum(block_any, jnp.where(valid, shifted, 0.0))
    block_mask = 1.0 - block_any
    scale = (h * w) / jnp.maximum(jnp.sum(block_mask), 1.0)
    return x * block_mask[None, None, :, :] * scale


if __name__ == "__main__":
    # DropBlock(drop_prob=0.15, block_size=3, feat_size=16)
    drop_prob, block_size, feat_size = 0.15, 3, 16
    assert feat_size > block_size
    gamma = drop_prob / block_size ** 2 * (
        feat_size ** 2 / (feat_size - block_size + 1) ** 2)

    key = jax.random.PRNGKey(0)
    kx, km = jax.random.split(key)
    x = jax.random.normal(kx, (2, 4, 16, 16), dtype=jnp.float32)
    # Bernoulli(gamma) sample over the spatial dims (training-mode path).
    mask = jax.random.bernoulli(km, gamma, (16, 16)).astype(jnp.float32)

    out = dropblock_forward(x, mask, block_size)
    jax.block_until_ready(out)

    ref = _reference(x, mask, block_size)
    assert jnp.allclose(out, ref, rtol=1e-5, atol=1e-5), "mismatch vs reference"

    print("KERNEL_OK")
</pallas_src>

<mosaic_0001>
module attributes {stable_mosaic.version = 11 : i64} {
  func.func @_apply_kernel(%arg0: i32, %arg1: memref<1x256xf32, #tpu.memory_space<vmem>>, %arg2: memref<8x256xf32, #tpu.memory_space<vmem>>, %arg3: memref<8x256xf32, #tpu.memory_space<vmem>>) attributes {dimension_semantics = [#tpu.dimension_semantics<parallel>], iteration_bounds = array<i64: 1>, scalar_prefetch = 0 : i64, scratch_operands = 0 : i64, tpu.core_type = #tpu.core_type<tc>, window_params = [{pipeline_mode = #tpu.pipeline_mode<synchronous>, transform_indices = @transform_0, window_bounds = array<i64: 1, 256>}, {transform_indices = @transform_1, window_bounds = array<i64: 8, 256>}, {transform_indices = @transform_2, window_bounds = array<i64: 8, 256>}]} {
    %c0 = arith.constant 0 : index
    %c0_0 = arith.constant 0 : index
    %0 = vector.load %arg2[%c0, %c0_0] : memref<8x256xf32, #tpu.memory_space<vmem>>, vector<8x256xf32>
    %c0_1 = arith.constant 0 : index
    %c0_2 = arith.constant 0 : index
    %1 = vector.load %arg1[%c0_1, %c0_2] : memref<1x256xf32, #tpu.memory_space<vmem>>, vector<1x256xf32>
    %2 = vector.broadcast %1 : vector<1x256xf32> to vector<8x256xf32>
    %3 = arith.mulf %0, %2 : vector<8x256xf32>
    %c0_3 = arith.constant 0 : index
    %c0_4 = arith.constant 0 : index
    %4 = vector.load %arg3[%c0_3, %c0_4] : memref<8x256xf32, #tpu.memory_space<vmem>>, vector<8x256xf32>
    tpu.vector_store %arg3[%c0_3, %c0_4], %3 {strides = array<i32>} : memref<8x256xf32, #tpu.memory_space<vmem>>, vector<8x256xf32>,
    return
  }
  func.func @transform_0(%arg0: i32) -> (i32, i32) {
    %c0_i32 = arith.constant 0 : i32
    %c0_i32_0 = arith.constant 0 : i32
    %c0_i32_1 = arith.constant 0 : i32
    return %c0_i32, %c0_i32_0 : i32, i32
  }
  func.func @transform_1(%arg0: i32) -> (i32, i32) {
    %c0_i32 = arith.constant 0 : i32
    %c0_i32_0 = arith.constant 0 : i32
    return %arg0, %c0_i32 : i32, i32
  }
  func.func @transform_2(%arg0: i32) -> (i32, i32) {
    %c0_i32 = arith.constant 0 : i32
    %c0_i32_0 = arith.constant 0 : i32
    return %arg0, %c0_i32 : i32, i32
  }
}

</mosaic_0001>

<bundles_post_ra>
// kernel: tpu_custom_call.1
= control target key start
LH: loop header
LB: loop body
LE: loop exit
PB: predicated region body
PF: predicated region fallthrough
CT: control target
= control target key end

     0   :  { %7 = vsyncpa [#allocation3], 0  ;;  %s199_s0 = inlined_call_operand.hbm [shape: f32[1,256], index: 0, kind: input, shape index: {}]   ;;  %s200_s1 = inlined_call_operand.hbm [shape: f32[8,256], index: 1, kind: input, shape index: {}]   ;;  %s201_s2 = inlined_call_operand.hbm [shape: f32[8,256], index: 2, kind: output, shape index: {}]  }
   0x1   :  { %8 = vsyncpa [#allocation6], 0 }
   0x2   :  { %9 = vsyncpa [#allocation4], 0  ;;  %s145_s9 = smov [#allocation2]   ;;  %s146_s11 = smov [#allocation5]  }
   0x3   :  { %s16_s10 = sshll.u32 %s145_s9, 4  ;;  %s26_s12 = sshll.u32 %s146_s11, 4  ;;  %s17_s10 = int_to_ptr.vmem [resolvable:$true] %s16_s10  ;;  %s27_s12 = int_to_ptr.vmem [resolvable:$true] %s26_s12 }
   0x4   :  { %s73_s15 = scalar_lea.hbm %s199_s0, 32 }
   0x5   :  { %p74_p0 = scmp.ne.s32.totalorder %s199_s0, %s73_s15  ;;  %p77_p1 = scmp.lt.u32.totalorder %s73_s15, %s199_s0 }
   0x7   :  { %p79_p2 = pnand %p77_p1, %p74_p0 }
   0x9   :  { %82 = shalt.err (!%p79_p2)
}
   0xa   :  { %s83_s20 = scalar_lea.vmem %s17_s10, 32  ;;  %p88_p4 = scmp.lt.s32.totalorder %s17_s10, %s17_s10 }
   0xb   :  { %p84_p3 = scmp.ne.s32.totalorder %s17_s10, %s83_s20  ;;  %p89_p5 = scmp.lt.s32.totalorder %s83_s20, %s83_s20 }
   0xd   :  { %p90_p6 = por %p89_p5, %p88_p4 }
   0xf   :  { %p91_p7 = pnand %p90_p6, %p84_p3 }
  0x11   :  { %94 = shalt.err (!%p91_p7)
}
  0x12   :  { %19 = dma.hbm_to_vmem [thread:$0]  %s199_s0, 32, %s17_s10, [#allocation3]  }
  0x13   :  { %s95_s25 = scalar_lea.hbm %s200_s1, 256 }
  0x14   :  { %p96_p8 = scmp.ne.s32.totalorder %s200_s1, %s95_s25  ;;  %p99_p9 = scmp.lt.u32.totalorder %s95_s25, %s200_s1 }
  0x16   :  { %p101_p10 = pnand %p99_p9, %p96_p8 }
  0x18   :  { %104 = shalt.err (!%p101_p10)
}
  0x19   :  { %s105_s30 = scalar_lea.vmem %s27_s12, 256  ;;  %p110_p12 = scmp.lt.s32.totalorder %s27_s12, %s27_s12 }
  0x1a   :  { %p106_p11 = scmp.ne.s32.totalorder %s27_s12, %s105_s30  ;;  %p111_p13 = scmp.lt.s32.totalorder %s105_s30, %s105_s30 }
  0x1c   :  { %p112_p0 = por %p111_p13, %p110_p12 }
  0x1e   :  { %p113_p1 = pnand %p112_p0, %p106_p11 }
  0x20   :  { %116 = shalt.err (!%p113_p1)
}
  0x21   :  { %29 = dma.hbm_to_vmem [thread:$0]  %s200_s1, 256, %s27_s12, [#allocation6]  }
  0x22   :  { %139 = dma.done.wait [#allocation3], 32  }
  0x23   :  { %140 = vsyncadd [#allocation3], 4294967264 }
  0x24   :  { %141 = dma.done.wait [#allocation6], 256  }
  0x25   :  { %142 = vsyncadd [#allocation6], 4294967040  ;;  %v40_v0 = vlaneseq  ;;  %v36_v4 = vld [vmem:[#allocation5] sm:$0xff]  ;;  %v38_v5 = vld [vmem:[#allocation2] sm:$0x3]  ;;  %s147_s4 = smov [#allocation7]  }
  0x26   :  { %v37_v6 = vld [vmem:[#allocation5 + $0x8] sm:$0xff]  ;;  %s60_s5 = sshll.u32 %s147_s4, 4  ;;  %s61_s5 = int_to_ptr.vmem [resolvable:$true] %s60_s5 }
  0x27   :  { %v41_v1 = vshrl.u32 %v40_v0, 7  ;;  %s117_s1 = scalar_lea.vmem %s61_s5, 256  ;;  %p122_p3 = scmp.lt.s32.totalorder %s61_s5, %s61_s5 }
  0x28   :  { %p118_p2 = scmp.ne.s32.totalorder %s61_s5, %s117_s1  ;;  %p123_p4 = scmp.lt.s32.totalorder %s117_s1, %s117_s1 }
  0x29   :  { %v42_v2 = vsub.s32 0, %v41_v1  ;;  %v46_v3 = vsub.s32 1, %v41_v1 }
  0x2a   :  { %p124_p5 = por %p123_p4, %p122_p3 }
  0x2b   :  { %v43_v7 = vrot.slane %v38_v5, %v42_v2  ;;  %v47_v8 = vrot.slane %v38_v5, %v46_v3 }
  0x2c   :  { %p125_p6 = pnand %p124_p5, %p118_p2 }
  0x2d   :  { %v50_v9 = vmul.f32 %v43_v7, %v36_v4  ;;  %v51_v10 = vmul.f32 %v47_v8, %v37_v6 }
  0x2f   :  { %52 = vst [vmem:[#allocation7] sm:$0xff] %v50_v9  ;;  %53 = vst [vmem:[#allocation7 + $0x8] sm:$0xff] %v51_v10 }
  0x30   :  { %128 = shalt.err (!%p125_p6)
}
  0x31   :  { %s129_s8 = scalar_lea.hbm %s201_s2, 256 }
  0x32   :  { %p130_p7 = scmp.ne.s32.totalorder %s201_s2, %s129_s8  ;;  %p133_p8 = scmp.lt.u32.totalorder %s129_s8, %s201_s2 }
  0x34   :  { %p135_p9 = pnand %p133_p8, %p130_p7 }
  0x36   :  { %138 = shalt.err (!%p135_p9)
}
  0x37   :  { %63 = dma.vmem_to_hbm [thread:$0]  %s61_s5, 256, %s201_s2, [#allocation4]  }
  0x38   :  { %143 = dma.done.wait [#allocation4], 256  }
  0x39   :  { %144 = vsyncadd [#allocation4], 4294967040 }
  0x3a   :  { %67 = vsyncpa [#allocation3], 1 }
  0x3b   :  { %68 = vsyncpa [#allocation6], 1 }
  0x3c   :  { %69 = vsyncpa [#allocation4], 1 }

</bundles_post_ra>
